<compile_context>
chip_gen: v5e
topology: v5e:2x2
jax: 0.10.0
libtpu: 0.0.40
codegen_flags: <defaults>
</compile_context>

<pallas_src>
import functools

import jax
import jax.numpy as jnp
from jax.experimental import pallas as pl
from jax.experimental.pallas import tpu as pltpu


def _mlp_kernel(x_ref, w1_ref, b1_ref, w2_ref, b2_ref, o_ref):
    # h = x @ W1 + b1   (W1 pre-transposed to [D_in, H]); accumulate in f32.
    x = x_ref[...].astype(w1_ref.dtype)
    h = jnp.dot(x, w1_ref[...], preferred_element_type=jnp.float32)
    h = jnp.tanh(h + b1_ref[...])                 # bias-add + tanh in f32
    # y = tanh(h) @ W2 + b2   (W2 pre-transposed to [H, D_out]).
    y = jnp.dot(h.astype(w2_ref.dtype), w2_ref[...],
                preferred_element_type=jnp.float32)
    o_ref[...] = (y + b2_ref[...]).astype(o_ref.dtype)


def predictor_forward(x, w1_t, b1, w2_t, b2, *, block_m=1024, compute_dtype=None):
    """Pallas forward pass.

    x: [N, D_in], w1_t: [D_in, H], b1: [H] or [1, H],
    w2_t: [H, D_out], b2: [D_out] or [1, D_out].

    compute_dtype: optional dtype for the matmul operands (e.g. jnp.bfloat16
    on v5e/v6e/v7x to halve the dominant x-read stream).  Accumulation,
    bias-add and tanh always run in f32; expect ~1e-2 deviation vs f32.
    """
    N, D_in = x.shape
    H = w1_t.shape[1]
    D_out = w2_t.shape[1]
    out_dtype = x.dtype

    # Biases as (1, H) / (1, D_out) f32 rows (broadcast inside the kernel).
    b1 = jnp.reshape(b1, (1, H)).astype(jnp.float32)
    b2 = jnp.reshape(b2, (1, D_out)).astype(jnp.float32)

    if compute_dtype is not None:
        # Weights are small & static: casting them here is cheap.  x is cast
        # inside the kernel (callers wanting the full bandwidth win should
        # pass x already in bf16).
        w1_t = w1_t.astype(compute_dtype)
        w2_t = w2_t.astype(compute_dtype)

    # Batch tiling: small batches run as one full-array block (no padding,
    # no (8,128) constraint since block == full dim).  Large batches use a
    # tile that is a multiple of 8 sublanes and row-pad only when needed.
    if N <= block_m:
        tm = N
        n_pad = 0
    else:
        tm = max(8, (block_m // 8) * 8)
        n_pad = (-N) % tm

    x_in = x if n_pad == 0 else jnp.pad(x, ((0, n_pad), (0, 0)))
    N_p = N + n_pad
    grid = (N_p // tm,)

    flops = 2 * N_p * (D_in * H + H * D_out)
    bytes_accessed = (
        N_p * D_in * x_in.dtype.itemsize            # x read
        + D_in * H * w1_t.dtype.itemsize            # W1
        + H * D_out * w2_t.dtype.itemsize           # W2
        + (H + D_out) * 4                           # biases
        + N_p * D_out * jnp.dtype(out_dtype).itemsize  # y write
    )

    y_p = pl.pallas_call(
        _mlp_kernel,
        out_shape=jax.ShapeDtypeStruct((N_p, D_out), out_dtype),
        grid=grid,
        in_specs=[
            # Batch-tiled activations (pipelined / double-buffered).
            pl.BlockSpec((tm, D_in), lambda i: (i, 0)),
            # Weights & biases: same block every iteration -> VMEM-resident.
            pl.BlockSpec((D_in, H), lambda i: (0, 0)),
            pl.BlockSpec((1, H), lambda i: (0, 0)),
            pl.BlockSpec((H, D_out), lambda i: (0, 0)),
            pl.BlockSpec((1, D_out), lambda i: (0, 0)),
        ],
        out_specs=pl.BlockSpec((tm, D_out), lambda i: (i, 0)),
        compiler_params=pltpu.CompilerParams(
            # Batch tiles are independent -> megacore-shardable on v7x.
            dimension_semantics=("parallel",),
        ),
        cost_estimate=pl.CostEstimate(
            flops=flops,
            transcendentals=N_p * H,
            bytes_accessed=bytes_accessed,
        ),
    )(x_in, w1_t, b1, w2_t, b2)

    return y_p if n_pad == 0 else y_p[:N]


def reference_forward(x, w1_t, b1, w2_t, b2):
    h = jnp.tanh(x @ w1_t + b1)
    return h @ w2_t + b2


if __name__ == "__main__":
    # D_in / H / D_out are module-level globals in the PyTorch source; pick
    # small concrete MLP sizes.
    D_in, H, D_out = 32, 64, 16

    key = jax.random.PRNGKey(0)
    k_x, k_w1, k_b1, k_w2, k_b2, k_x2 = jax.random.split(key, 6)

    # Deterministic synthetic parameters (mimics nn.Linear uniform bounds),
    # stored pre-transposed ([D_in, H], [H, D_out]) for row-major matmuls.
    bound1 = 1.0 / (D_in ** 0.5)
    w1_t = jax.random.uniform(k_w1, (D_in, H), minval=-bound1, maxval=bound1,
                              dtype=jnp.float32)
    b1 = jax.random.uniform(k_b1, (1, H), minval=-bound1, maxval=bound1,
                            dtype=jnp.float32)
    bound2 = 1.0 / (H ** 0.5)
    w2_t = jax.random.uniform(k_w2, (H, D_out), minval=-bound2, maxval=bound2,
                              dtype=jnp.float32)
    b2 = jax.random.uniform(k_b2, (1, D_out), minval=-bound2, maxval=bound2,
                            dtype=jnp.float32)

    # Test 1: tiny batch (single full-array block, no padding).
    fwd_default = jax.jit(predictor_forward)
    x_small = jax.random.normal(k_x, (8, D_in), dtype=jnp.float32)
    y_small = fwd_default(x_small, w1_t, b1, w2_t, b2)
    jax.block_until_ready(y_small)
    y_small_ref = reference_forward(x_small, w1_t, b1, w2_t, b2)
    assert y_small.shape == (8, D_out)
    assert jnp.allclose(y_small, y_small_ref, atol=1e-5, rtol=1e-5)

    # Test 2: ragged batch with a small tile (exercises multi-step grid,
    # VMEM-resident weights across iterations, and row padding).
    fwd_tiled = jax.jit(functools.partial(predictor_forward, block_m=128))
    x_big = jax.random.normal(k_x2, (300, D_in), dtype=jnp.float32)
    y_big = fwd_tiled(x_big, w1_t, b1, w2_t, b2)
    jax.block_until_ready(y_big)
    y_big_ref = reference_forward(x_big, w1_t, b1, w2_t, b2)
    assert y_big.shape == (300, D_out)
    assert jnp.allclose(y_big, y_big_ref, atol=1e-5, rtol=1e-5)

    # Test 3: opt-in bf16 operand path (bandwidth optimization; looser tol).
    fwd_bf16 = jax.jit(functools.partial(predictor_forward,
                                         compute_dtype=jnp.bfloat16))
    y_bf16 = fwd_bf16(x_big, w1_t, b1, w2_t, b2)
    jax.block_until_ready(y_bf16)
    assert y_bf16.shape == (300, D_out)
    assert jnp.allclose(y_bf16, y_big_ref, atol=5e-2, rtol=5e-2)

    # TODO(synk): `neighbours` / `fast_neighbours` are helper methods never
    # called in forward() (fast_neighbours is broken in the source); not part
    # of the kernel.
    print("KERNEL_OK")
</pallas_src>

<mosaic_0001>
module attributes {stable_mosaic.version = 11 : i64} {
  func.func @_mlp_kernel(%arg0: i32, %arg1: memref<8x32xf32, #tpu.memory_space<vmem>>, %arg2: memref<32x64xf32, #tpu.memory_space<vmem>>, %arg3: memref<1x64xf32, #tpu.memory_space<vmem>>, %arg4: memref<64x16xf32, #tpu.memory_space<vmem>>, %arg5: memref<1x16xf32, #tpu.memory_space<vmem>>, %arg6: memref<8x16xf32, #tpu.memory_space<vmem>>) attributes {dimension_semantics = [#tpu.dimension_semantics<parallel>], iteration_bounds = array<i64: 1>, scalar_prefetch = 0 : i64, scratch_operands = 0 : i64, tpu.core_type = #tpu.core_type<tc>, window_params = [{transform_indices = @transform_0, window_bounds = array<i64: 8, 32>}, {pipeline_mode = #tpu.pipeline_mode<synchronous>, transform_indices = @transform_1, window_bounds = array<i64: 32, 64>}, {pipeline_mode = #tpu.pipeline_mode<synchronous>, transform_indices = @transform_2, window_bounds = array<i64: 1, 64>}, {pipeline_mode = #tpu.pipeline_mode<synchronous>, transform_indices = @transform_3, window_bounds = array<i64: 64, 16>}, {pipeline_mode = #tpu.pipeline_mode<synchronous>, transform_indices = @transform_4, window_bounds = array<i64: 1, 16>}, {transform_indices = @transform_5, window_bounds = array<i64: 8, 16>}]} {
    %c0 = arith.constant 0 : index
    %c0_0 = arith.constant 0 : index
    %0 = vector.load %arg1[%c0, %c0_0] : memref<8x32xf32, #tpu.memory_space<vmem>>, vector<8x32xf32>
    %c0_1 = arith.constant 0 : index
    %c0_2 = arith.constant 0 : index
    %1 = vector.load %arg2[%c0_1, %c0_2] : memref<32x64xf32, #tpu.memory_space<vmem>>, vector<32x64xf32>
    %cst = arith.constant dense<0.000000e+00> : vector<8x64xf32>
    %2 = tpu.matmul %0, %1, %cst {dimension_numbers = #tpu.dot_dimension_numbers<[1], [0], [0], [1], [0, 0, 1, 1], [], []>} : vector<8x32xf32>, vector<32x64xf32>, vector<8x64xf32> -> vector<8x64xf32>
    %c0_3 = arith.constant 0 : index
    %c0_4 = arith.constant 0 : index
    %3 = vector.load %arg3[%c0_3, %c0_4] : memref<1x64xf32, #tpu.memory_space<vmem>>, vector<1x64xf32>
    %4 = vector.broadcast %3 : vector<1x64xf32> to vector<8x64xf32>
    %5 = arith.addf %2, %4 : vector<8x64xf32>
    %6 = math.tanh %5 : vector<8x64xf32>
    %c0_5 = arith.constant 0 : index
    %c0_6 = arith.constant 0 : index
    %7 = vector.load %arg4[%c0_5, %c0_6] : memref<64x16xf32, #tpu.memory_space<vmem>>, vector<64x16xf32>
    %cst_7 = arith.constant dense<0.000000e+00> : vector<8x16xf32>
    %8 = tpu.matmul %6, %7, %cst_7 {dimension_numbers = #tpu.dot_dimension_numbers<[1], [0], [0], [1], [0, 0, 1, 1], [], []>} : vector<8x64xf32>, vector<64x16xf32>, vector<8x16xf32> -> vector<8x16xf32>
    %c0_8 = arith.constant 0 : index
    %c0_9 = arith.constant 0 : index
    %9 = vector.load %arg5[%c0_8, %c0_9] : memref<1x16xf32, #tpu.memory_space<vmem>>, vector<1x16xf32>
    %10 = vector.broadcast %9 : vector<1x16xf32> to vector<8x16xf32>
    %11 = arith.addf %8, %10 : vector<8x16xf32>
    %c0_10 = arith.constant 0 : index
    %c0_11 = arith.constant 0 : index
    %12 = vector.load %arg6[%c0_10, %c0_11] : memref<8x16xf32, #tpu.memory_space<vmem>>, vector<8x16xf32>
    tpu.vector_store %arg6[%c0_10, %c0_11], %11 {strides = array<i32>} : memref<8x16xf32, #tpu.memory_space<vmem>>, vector<8x16xf32>,
    return
  }
  func.func @transform_0(%arg0: i32) -> (i32, i32) {
    %c0_i32 = arith.constant 0 : i32
    %c0_i32_0 = arith.constant 0 : i32
    return %arg0, %c0_i32 : i32, i32
  }
  func.func @transform_1(%arg0: i32) -> (i32, i32) {
    %c0_i32 = arith.constant 0 : i32
    %c0_i32_0 = arith.constant 0 : i32
    %c0_i32_1 = arith.constant 0 : i32
    return %c0_i32, %c0_i32_0 : i32, i32
  }
  func.func @transform_2(%arg0: i32) -> (i32, i32) {
    %c0_i32 = arith.constant 0 : i32
    %c0_i32_0 = arith.constant 0 : i32
    %c0_i32_1 = arith.constant 0 : i32
    return %c0_i32, %c0_i32_0 : i32, i32
  }
  func.func @transform_3(%arg0: i32) -> (i32, i32) {
    %c0_i32 = arith.constant 0 : i32
    %c0_i32_0 = arith.constant 0 : i32
    %c0_i32_1 = arith.constant 0 : i32
    return %c0_i32, %c0_i32_0 : i32, i32
  }
  func.func @transform_4(%arg0: i32) -> (i32, i32) {
    %c0_i32 = arith.constant 0 : i32
    %c0_i32_0 = arith.constant 0 : i32
    %c0_i32_1 = arith.constant 0 : i32
    return %c0_i32, %c0_i32_0 : i32, i32
  }
  func.func @transform_5(%arg0: i32) -> (i32, i32) {
    %c0_i32 = arith.constant 0 : i32
    %c0_i32_0 = arith.constant 0 : i32
    return %arg0, %c0_i32 : i32, i32
  }
}

</mosaic_0001>

<bundles_post_ra>
// kernel: predictor_forward.1
= control target key start
LH: loop header
LB: loop body
LE: loop exit
PB: predicated region body
PF: predicated region fallthrough
CT: control target
= control target key end

     0   :  { %s221_s0 = inlined_call_operand.vmem [shape: f32[8,32], index: 0, kind: input, shape index: {}]   ;;  %s222_s1 = inlined_call_operand.vmem [shape: f32[32,64], index: 1, kind: input, shape index: {}]   ;;  %s223_s2 = inlined_call_operand.vmem [shape: f32[1,64], index: 2, kind: input, shape index: {}]   ;;  %s224_s3 = inlined_call_operand.vmem [shape: f32[64,16], index: 3, kind: input, shape index: {}]   ;;  %s225_s4 = inlined_call_operand.vmem [shape: f32[1,16], index: 4, kind: input, shape index: {}]   ;;  %s226_s5 = inlined_call_operand.hbm [shape: f32[8,16], index: 5, kind: output, shape index: {}]  }
   0x1   :  { %v25_v0 = vld [vmem:[%s222_s1 + $0x18] sm:$0xff]  ;;  %v24_v1 = vld [vmem:[%s222_s1 + $0x10] sm:$0xff]  ;;  %v23_v3 = vld [vmem:[%s222_s1 + $0x8] sm:$0xff] }
   0x2   :  { %46 = vmatpush.msra.mxu0 %v25_v0  ;;  %v62_v2 = vld [vmem:[%s224_s3 + $0x38] sm:$0xff]  ;;  %v61_v4 = vld [vmem:[%s224_s3 + $0x30] sm:$0xff]  ;;  %v60_v5 = vld [vmem:[%s224_s3 + $0x28] sm:$0xff] }
   0x3   :  { %79 = vmatpush.msra.mxu1 %v62_v2 }
   0x4   :  { %47 = vmatpush.msra.mxu0 %v24_v1 }
   0x5   :  { %10 = vsyncpa [#allocation3], 0  ;;  %v22_v6 = vld [vmem:[%s222_s1] sm:$0xff]  ;;  %80 = vmatpush.msra.mxu1 %v61_v4  ;;  %vm30_vm0 = vcmask 261120   ;;  %v58_v9 = vld [vmem:[%s224_s3 + $0x18] sm:$0xff]  ;;  %vm67_vm1 = vcmask 523264  }
   0x6   :  { %48 = vmatpush.msra.mxu0 %v23_v3  ;;  %v21_v7 = vld [vmem:[%s221_s0] sm:$0xff]  ;;  %v57_v10 = vld [vmem:[%s224_s3 + $0x10] sm:$0xff]  ;;  %v56_v11 = vld [vmem:[%s224_s3 + $0x8] sm:$0xff]  ;;  %s142_s21 = smov [#allocation2]   ;;  %s100_s24 = sshll.u32 %s226_s5, 4  ;;  %vm91_vm2 = vcmask 130048   ;;  %s101_s24 = int_to_ptr.hbm [resolvable:$true] %s100_s24 }
   0x7   :  { %81 = vmatpush.msra.mxu1 %v60_v5  ;;  %v59_v8 = vld [vmem:[%s224_s3 + $0x20] sm:$0xff]  ;;  %s98_s22 = sshll.u32 %s142_s21, 4  ;;  %s99_s22 = int_to_ptr.vmem [resolvable:$true] %s98_s22 }
   0x8   :  { %49 = vmatpush.msra.mxu0 %v22_v6  ;;  %v55_v12 = vld [vmem:[%s224_s3] sm:$0xff] }
   0x9   :  { %109 = vmatmul.msk.f32.vlgmr.msra.gmra.mxu0 %vm30_vm0, %v21_v7  ;;  %82 = vmatpush.msra.mxu1 %v59_v8  ;;  %v112_v13 = vld [vmem:[%s223_s2] ss:$0 sm:$0xff] }
   0xa   :  { %v113_v17 = vld [vmem:[%s225_s4] ss:$0 sm:$0xff] }
   0xb   :  { %83 = vmatpush.msra.mxu1 %v58_v9 }
   0xd   :  { %84 = vmatpush.msra.mxu1 %v57_v10 }
   0xf   :  { %85 = vmatpush.msra.mxu1 %v56_v11 }
  0x11   :  { %86 = vmatpush.msra.mxu1 %v55_v12 }
  0x86   :  { %v51_v14 = vpop.f32.mrf.mxu0 }
  0x87   :  { %v52_v15 = vadd.f32 %v112_v13, %v51_v14 }
  0x89   :  { %114 = vtanh.f32 %v52_v15 }
  0x8f   :  { %v115_v16 = vpop.eup %114 }
  0x90   :  { %110 = vmatmul.msk.f32.vlgmr.msra.gmra.mxu1 %vm67_vm1, %v115_v16 }
 0x10d   :  { %v88_v18 = vpop.f32.mrf.mxu1 }
 0x10e   :  { %v89_v19 = vadd.f32 %v113_v17, %v88_v18 }
 0x110   :  { %92 = vst.msk [vmem:[#allocation2] sm:$0xff] %vm91_vm2, %v89_v19 }
 0x111   :  { %103 = dma.vmem_to_hbm [thread:$0]  %s99_s22, 128, %s101_s24, [#allocation3]  }
 0x112   :  { %140 = dma.done.wait [#allocation3], 128  }
 0x113   :  { %141 = vsyncadd [#allocation3], 4294967168 }
 0x114   :  { %108 = vsyncpa [#allocation3], 1 }

</bundles_post_ra>
